<compile_context>
chip_gen: v5e
topology: v5e:2x2
jax: 0.10.0
libtpu: 0.0.40
codegen_flags: <defaults>
</compile_context>

<pallas_src>
import math
import jax
import jax.numpy as jnp
from jax.experimental import pallas as pl
from jax.experimental.pallas import tpu as pltpu

D_MODEL = 32
N_HEADS = 4
D_FF = 64
D_HEAD = D_MODEL // N_HEADS
EPS = 1e-6
NEG_INF = -1e18
VEC_PAD = 128   # lane width of the packed small-vector slab


def _normalize(x):
    # OpenNMT LayerNorm core: (x - mean) / (std + eps), std is unbiased.
    # gamma/beta are folded into the downstream projection weights in the wrapper.
    d = x.shape[-1]
    mean = jnp.mean(x, axis=-1, keepdims=True)
    var = jnp.sum((x - mean) ** 2, axis=-1, keepdims=True) * (1.0 / (d - 1))
    inv = 1.0 / (jnp.sqrt(var) + EPS)          # divide only on the [R, 1] column
    return (x - mean) * inv


def encoder_layer_kernel(x_ref, mask_ref, wslab_ref, w2_ref, vecs_ref, o_ref):
    NB, S, D = x_ref.shape
    R = NB * S

    # ---- unpack parameter slabs (static slices, no extra DMA streams) ----
    vecs = vecs_ref[...]                        # [8, 128]
    bqkv = vecs[0:1, :3 * D]                    # LN1 beta already folded in
    bo   = vecs[1:2, :D]
    bw1  = vecs[2:3, :D_FF]                     # LN2 beta already folded in
    bw2  = vecs[3:4, :D]

    wslab = wslab_ref[...]                      # [D, 4D + D_FF]
    wqkv = wslab[:, :3 * D]                     # [D, 3D]  (1/sqrt(dh) and g1 folded)
    wo   = wslab[:, 3 * D:4 * D]                # [D, D]
    w1   = wslab[:, 4 * D:4 * D + D_FF]         # [D, D_FF] (g2 folded)
    w2   = w2_ref[...]                          # [D_FF, D]
    # TODO(synk): on v6e/v7x the matmul operands could be cast to bf16 (f32 accum);
    # kept f32 here to preserve the tight correctness check.

    x3 = x_ref[...]                             # [NB, S, D]
    x2 = x3.reshape(R, D)                       # collapse leading dims (layout-preserving)
    mask = mask_ref[...]                        # [NB, 1, S]

    # Additive attention bias computed once (hoisted out of all per-head work).
    mbias = jnp.where(mask > 0.0, NEG_INF, 0.0)             # [NB, 1, S]

    # ---------------- self-attention sub-layer ----------------
    z1 = _normalize(x2)                                     # [R, D]
    qkv = jnp.dot(z1, wqkv, preferred_element_type=jnp.float32) + bqkv   # [R, 3D]
    qkv3 = qkv.reshape(NB, S, 3 * D)
    q3 = qkv3[:, :, :D]             # already scaled by 1/sqrt(d_head) via wq/bq
    k3 = qkv3[:, :, D:2 * D]
    v3 = qkv3[:, :, 2 * D:3 * D]

    # Per-head scores via batched MXU matmuls; softmax vectorized across heads.
    # TODO(synk): for large S, tile the key axis (flash-style online softmax) so the
    # [H, NB, S, S] score tensor never materializes (v7x 64 MiB VMEM budget).
    score_parts = []
    for h in range(N_HEADS):
        hs = h * D_HEAD
        qh = q3[:, :, hs:hs + D_HEAD]
        kh = k3[:, :, hs:hs + D_HEAD]
        score_parts.append(
            jnp.einsum('bqd,bkd->bqk', qh, kh, preferred_element_type=jnp.float32))
    scores = jnp.stack(score_parts, axis=0) + mbias[None]   # [H, NB, S, S]

    m = jnp.max(scores, axis=-1, keepdims=True)
    p = jnp.exp(scores - m)
    denom = jnp.sum(p, axis=-1, keepdims=True)
    # EUP approximate reciprocal (separate VLIW slot, off the VPU); the small
    # relative error is covered by the relaxed 5e-3 tolerance in the self-test.
    probs = p * pl.reciprocal(denom, approx=True)           # [H, NB, S, S]

    # Accumulate the output projection head-by-head: residual + bo + sum_h ctx_h @ wo_h.
    # Avoids a lane-axis concat; only one small ctx tensor is live per iteration.
    acc = x2 + bo                                           # residual + output bias
    for h in range(N_HEADS):
        hs = h * D_HEAD
        vh = v3[:, :, hs:hs + D_HEAD]
        ctx_h = jnp.einsum('bqk,bkd->bqd', probs[h], vh,
                           preferred_element_type=jnp.float32)          # [NB, S, Dh]
        acc = acc + jnp.dot(ctx_h.reshape(R, D_HEAD), wo[hs:hs + D_HEAD, :],
                            preferred_element_type=jnp.float32)
    out = acc                       # dropout == identity (eval mode)

    # ---------------- positionwise feed-forward sub-layer ----------------
    z2 = _normalize(out)
    h1 = jnp.maximum(jnp.dot(z2, w1, preferred_element_type=jnp.float32) + bw1, 0.0)
    y = jnp.dot(h1, w2, preferred_element_type=jnp.float32) + bw2 + out

    # TODO(synk): a lane-dense (NB, S*D) output view would need an in-kernel minor-dim
    # reshape; kept the natural (NB, S, D) store and rely on block_b batching instead.
    o_ref[...] = y.reshape(NB, S, D)


def _pick_block_b(B):
    # Batch several sequences per grid step to amortize per-step overhead, but keep
    # at least 2 grid steps when possible so both v7x TensorCores get work.
    for nb in (8, 4, 2):
        if B % nb == 0 and B // nb >= 2:
            return nb
    return 1


def _pack_params(params):
    assert 3 * D_MODEL <= VEC_PAD and D_FF <= VEC_PAD
    scale = 1.0 / math.sqrt(D_HEAD)
    wq = params["wq"] * scale          # fold 1/sqrt(d_head) into the Q projection
    bq = params["bq"] * scale
    wqkv = jnp.concatenate([wq, params["wk"], params["wv"]], axis=1)        # [D, 3D]
    bqkv = jnp.concatenate([bq, params["bk"], params["bv"]], axis=1)        # [1, 3D]

    # Fold LayerNorm-1 gamma/beta into the fused QKV projection:
    #   (g1*z + b1) @ W + b  ==  z @ (diag(g1) W) + (b1 @ W + b)
    wqkv_eff = params["g1"].reshape(D_MODEL, 1) * wqkv
    bqkv_eff = params["b1"] @ wqkv + bqkv
    # Fold LayerNorm-2 gamma/beta into the first FFN projection.
    w1_eff = params["g2"].reshape(D_MODEL, 1) * params["w1"]
    bw1_eff = params["b2"] @ params["w1"] + params["bw1"]

    w_slab = jnp.concatenate([wqkv_eff, params["wo"], w1_eff], axis=1)      # [D, 4D+D_FF]

    def row(v):
        v = v.reshape(-1).astype(jnp.float32)
        return jnp.pad(v, (0, VEC_PAD - v.shape[0]))

    rows = [row(bqkv_eff), row(params["bo"]), row(bw1_eff), row(params["bw2"])]
    rows += [jnp.zeros((VEC_PAD,), jnp.float32)] * 4
    vecs = jnp.stack(rows, axis=0)                                          # [8, 128]
    return (w_slab.astype(jnp.float32), params["w2"].astype(jnp.float32), vecs)


def transformer_encoder_layer(x, mask, params, block_b=None):
    B, S, D = x.shape
    assert D == D_MODEL
    if block_b is None:
        block_b = _pick_block_b(B)
    assert B % block_b == 0, "block_b must divide the batch size"
    grid = (B // block_b,)

    w_slab, w2, vecs = _pack_params(params)

    in_specs = [
        pl.BlockSpec((block_b, S, D), lambda i: (i, 0, 0)),   # x
        pl.BlockSpec((block_b, 1, S), lambda i: (i, 0, 0)),   # mask
        pl.BlockSpec(w_slab.shape, lambda i: (0, 0)),         # packed weight slab
        pl.BlockSpec(w2.shape, lambda i: (0, 0)),             # w2
        pl.BlockSpec(vecs.shape, lambda i: (0, 0)),           # packed bias slab
    ]
    out_spec = pl.BlockSpec((block_b, S, D), lambda i: (i, 0, 0))

    return pl.pallas_call(
        encoder_layer_kernel,
        out_shape=jax.ShapeDtypeStruct((B, S, D), jnp.float32),
        grid_spec=pltpu.PrefetchScalarGridSpec(
            num_scalar_prefetch=0,
            grid=grid,
            in_specs=in_specs,
            out_specs=out_spec),
        compiler_params=pltpu.CompilerParams(dimension_semantics=("parallel",)),
    )(x, mask, w_slab, w2, vecs)


# ---------------- pure-JAX reference for correctness check ----------------
def reference(x, mask, p):
    def ln(t, g, b):
        d = t.shape[-1]
        mean = jnp.mean(t, -1, keepdims=True)
        std = jnp.sqrt(jnp.sum((t - mean) ** 2, -1, keepdims=True) / (d - 1))
        return g * (t - mean) / (std + EPS) + b

    B, S, D = x.shape
    xn = ln(x, p["g1"], p["b1"])
    q = xn @ p["wq"] + p["bq"]
    k = xn @ p["wk"] + p["bk"]
    v = xn @ p["wv"] + p["bv"]

    def heads(t):
        return t.reshape(B, S, N_HEADS, D_HEAD).transpose(0, 2, 1, 3)

    qh, kh, vh = heads(q), heads(k), heads(v)
    scores = jnp.einsum("bhqd,bhkd->bhqk", qh, kh) / math.sqrt(D_HEAD)
    scores = jnp.where(mask[:, None, :, :] > 0.0, NEG_INF, scores)
    pa = jax.nn.softmax(scores, axis=-1)
    ctx = jnp.einsum("bhqk,bhkd->bhqd", pa, vh).transpose(0, 2, 1, 3).reshape(B, S, D)
    out = ctx @ p["wo"] + p["bo"] + x
    on = ln(out, p["g2"], p["b2"])
    h1 = jax.nn.relu(on @ p["w1"] + p["bw1"])
    return h1 @ p["w2"] + p["bw2"] + out


def init_params(key):
    ks = jax.random.split(key, 16)

    def w(k, shape, scale=0.1):
        return scale * jax.random.normal(k, shape, jnp.float32)

    return {
        "g1": 1.0 + w(ks[0], (1, D_MODEL)),
        "b1": w(ks[1], (1, D_MODEL)),
        "wq": w(ks[2], (D_MODEL, D_MODEL)),
        "bq": w(ks[3], (1, D_MODEL)),
        "wk": w(ks[4], (D_MODEL, D_MODEL)),
        "bk": w(ks[5], (1, D_MODEL)),
        "wv": w(ks[6], (D_MODEL, D_MODEL)),
        "bv": w(ks[7], (1, D_MODEL)),
        "wo": w(ks[8], (D_MODEL, D_MODEL)),
        "bo": w(ks[9], (1, D_MODEL)),
        "g2": 1.0 + w(ks[10], (1, D_MODEL)),
        "b2": w(ks[11], (1, D_MODEL)),
        "w1": w(ks[12], (D_MODEL, D_FF)),
        "bw1": w(ks[13], (1, D_FF)),
        "w2": w(ks[14], (D_FF, D_MODEL)),
        "bw2": w(ks[15], (1, D_MODEL)),
    }


if __name__ == "__main__":
    B, S = 4, 8
    key = jax.random.PRNGKey(0)
    kx, kp = jax.random.split(key)
    x = jax.random.normal(kx, (B, S, D_MODEL), jnp.float32)
    # mask: 1.0 marks masked-out key positions
    mask = jnp.zeros((B, 1, S), jnp.float32)
    mask = mask.at[1, 0, S - 2:].set(1.0)
    mask = mask.at[3, 0, S - 3:].set(1.0)
    params = init_params(kp)

    y = transformer_encoder_layer(x, mask, params)   # block_b=2 -> grid=(2,)
    jax.block_until_ready(y)

    y_ref = reference(x, mask, params)
    assert y.shape == (B, S, D_MODEL)
    max_err = float(jnp.max(jnp.abs(y - y_ref)))
    # Tolerance relaxed vs. exact f32 math because the softmax uses the EUP
    # approximate reciprocal.
    assert jnp.allclose(y, y_ref, atol=5e-3, rtol=5e-3), \
        f"mismatch vs JAX reference (max abs err {max_err:.2e})"
    print("KERNEL_OK")
</pallas_src>

<mosaic_0001>
module attributes {stable_mosaic.version = 11 : i64} {
  func.func @encoder_layer_kernel(%arg0: i32, %arg1: memref<2x8x32xf32, #tpu.memory_space<vmem>>, %arg2: memref<2x1x8xf32, #tpu.memory_space<vmem>>, %arg3: memref<32x192xf32, #tpu.memory_space<vmem>>, %arg4: memref<64x32xf32, #tpu.memory_space<vmem>>, %arg5: memref<8x128xf32, #tpu.memory_space<vmem>>, %arg6: memref<2x8x32xf32, #tpu.memory_space<vmem>>) attributes {dimension_semantics = [#tpu.dimension_semantics<parallel>], iteration_bounds = array<i64: 2>, scalar_prefetch = 0 : i64, scratch_operands = 0 : i64, tpu.core_type = #tpu.core_type<tc>, window_params = [{transform_indices = @transform_0, window_bounds = array<i64: 2, 8, 32>}, {transform_indices = @transform_1, window_bounds = array<i64: 2, 1, 8>}, {pipeline_mode = #tpu.pipeline_mode<synchronous>, transform_indices = @transform_2, window_bounds = array<i64: 32, 192>}, {pipeline_mode = #tpu.pipeline_mode<synchronous>, transform_indices = @transform_3, window_bounds = array<i64: 64, 32>}, {pipeline_mode = #tpu.pipeline_mode<synchronous>, transform_indices = @transform_4, window_bounds = array<i64: 8, 128>}, {transform_indices = @transform_5, window_bounds = array<i64: 2, 8, 32>}]} {
    %c0 = arith.constant 0 : index
    %c0_0 = arith.constant 0 : index
    %0 = vector.load %arg5[%c0, %c0_0] : memref<8x128xf32, #tpu.memory_space<vmem>>, vector<8x128xf32>
    %1 = vector.extract_strided_slice %0 {offsets = [0, 0], sizes = [1, 96], strides = [1, 1]} : vector<8x128xf32> to vector<1x96xf32>
    %2 = vector.extract_strided_slice %0 {offsets = [1, 0], sizes = [1, 32], strides = [1, 1]} : vector<8x128xf32> to vector<1x32xf32>
    %3 = vector.extract_strided_slice %0 {offsets = [2, 0], sizes = [1, 64], strides = [1, 1]} : vector<8x128xf32> to vector<1x64xf32>
    %4 = vector.extract_strided_slice %0 {offsets = [3, 0], sizes = [1, 32], strides = [1, 1]} : vector<8x128xf32> to vector<1x32xf32>
    %c0_1 = arith.constant 0 : index
    %c0_2 = arith.constant 0 : index
    %5 = vector.load %arg3[%c0_1, %c0_2] : memref<32x192xf32, #tpu.memory_space<vmem>>, vector<32x192xf32>
    %6 = vector.extract_strided_slice %5 {offsets = [0, 0], sizes = [32, 96], strides = [1, 1]} : vector<32x192xf32> to vector<32x96xf32>
    %7 = vector.extract_strided_slice %5 {offsets = [0, 96], sizes = [32, 32], strides = [1, 1]} : vector<32x192xf32> to vector<32x32xf32>
    %8 = vector.extract_strided_slice %5 {offsets = [0, 128], sizes = [32, 64], strides = [1, 1]} : vector<32x192xf32> to vector<32x64xf32>
    %c0_3 = arith.constant 0 : index
    %c0_4 = arith.constant 0 : index
    %9 = vector.load %arg4[%c0_3, %c0_4] : memref<64x32xf32, #tpu.memory_space<vmem>>, vector<64x32xf32>
    %c0_5 = arith.constant 0 : index
    %c0_6 = arith.constant 0 : index
    %c0_7 = arith.constant 0 : index
    %10 = vector.load %arg1[%c0_5, %c0_6, %c0_7] : memref<2x8x32xf32, #tpu.memory_space<vmem>>, vector<2x8x32xf32>
    %11 = vector.shape_cast %10 : vector<2x8x32xf32> to vector<16x32xf32>
    %c0_8 = arith.constant 0 : index
    %c0_9 = arith.constant 0 : index
    %c0_10 = arith.constant 0 : index
    %12 = vector.load %arg2[%c0_8, %c0_9, %c0_10] : memref<2x1x8xf32, #tpu.memory_space<vmem>>, vector<2x1x8xf32>
    %cst = arith.constant 0.000000e+00 : f32
    %13 = vector.broadcast %cst : f32 to vector<2x1x8xf32>
    %14 = arith.cmpf ogt, %12, %13 : vector<2x1x8xf32>
    %cst_11 = arith.constant -9.99999984E+17 : f32
    %cst_12 = arith.constant 0.000000e+00 : f32
    %15 = vector.broadcast %cst_11 : f32 to vector<2x1x8xf32>
    %16 = vector.broadcast %cst_12 : f32 to vector<2x1x8xf32>
    %17 = arith.select %14, %15, %16 : vector<2x1x8xi1>, vector<2x1x8xf32>
    %cst_13 = arith.constant dense<0.000000e+00> : vector<16xf32>
    %18 = vector.multi_reduction <add>, %11, %cst_13 [1] : vector<16x32xf32> to vector<16xf32>
    %19 = vector.shape_cast %18 : vector<16xf32> to vector<16x1xf32>
    %cst_14 = arith.constant 3.200000e+01 : f32
    %20 = vector.broadcast %cst_14 : f32 to vector<16x1xf32>
    %21 = arith.divf %19, %20 : vector<16x1xf32>
    %22 = vector.broadcast %21 : vector<16x1xf32> to vector<16x32xf32>
    %23 = arith.subf %11, %22 : vector<16x32xf32>
    %24 = arith.mulf %23, %23 : vector<16x32xf32>
    %cst_15 = arith.constant dense<0.000000e+00> : vector<16xf32>
    %25 = vector.multi_reduction <add>, %24, %cst_15 [1] : vector<16x32xf32> to vector<16xf32>
    %26 = vector.shape_cast %25 : vector<16xf32> to vector<16x1xf32>
    %cst_16 = arith.constant 0.0322580636 : f32
    %27 = vector.broadcast %cst_16 : f32 to vector<16x1xf32>
    %28 = arith.mulf %26, %27 : vector<16x1xf32>
    %29 = math.sqrt %28 : vector<16x1xf32>
    %cst_17 = arith.constant 9.99999997E-7 : f32
    %30 = vector.broadcast %cst_17 : f32 to vector<16x1xf32>
    %31 = arith.addf %29, %30 : vector<16x1xf32>
    %cst_18 = arith.constant 1.000000e+00 : f32
    %32 = vector.broadcast %cst_18 : f32 to vector<16x1xf32>
    %33 = arith.divf %32, %31 : vector<16x1xf32>
    %34 = vector.broadcast %21 : vector<16x1xf32> to vector<16x32xf32>
    %35 = arith.subf %11, %34 : vector<16x32xf32>
    %36 = vector.broadcast %33 : vector<16x1xf32> to vector<16x32xf32>
    %37 = arith.mulf %35, %36 : vector<16x32xf32>
    %cst_19 = arith.constant dense<0.000000e+00> : vector<16x96xf32>
    %38 = tpu.matmul %37, %6, %cst_19 {dimension_numbers = #tpu.dot_dimension_numbers<[1], [0], [0], [1], [0, 0, 1, 1], [], []>} : vector<16x32xf32>, vector<32x96xf32>, vector<16x96xf32> -> vector<16x96xf32>
    %39 = vector.broadcast %1 : vector<1x96xf32> to vector<16x96xf32>
    %40 = arith.addf %38, %39 : vector<16x96xf32>
    %41 = vector.shape_cast %40 : vector<16x96xf32> to vector<2x8x96xf32>
    %42 = vector.extract_strided_slice %41 {offsets = [0, 0, 0], sizes = [2, 8, 32], strides = [1, 1, 1]} : vector<2x8x96xf32> to vector<2x8x32xf32>
    %43 = vector.extract_strided_slice %41 {offsets = [0, 0, 32], sizes = [2, 8, 32], strides = [1, 1, 1]} : vector<2x8x96xf32> to vector<2x8x32xf32>
    %44 = vector.extract_strided_slice %41 {offsets = [0, 0, 64], sizes = [2, 8, 32], strides = [1, 1, 1]} : vector<2x8x96xf32> to vector<2x8x32xf32>
    %45 = vector.extract_strided_slice %42 {offsets = [0, 0, 0], sizes = [2, 8, 8], strides = [1, 1, 1]} : vector<2x8x32xf32> to vector<2x8x8xf32>
    %46 = vector.extract_strided_slice %43 {offsets = [0, 0, 0], sizes = [2, 8, 8], strides = [1, 1, 1]} : vector<2x8x32xf32> to vector<2x8x8xf32>
    "tpu.trace_start"() <{level = 10 : i32, message = "bqd,bkd->bqk"}> : () -> ()
    %cst_20 = arith.constant dense<0.000000e+00> : vector<2x8x8xf32>
    %47 = tpu.matmul %45, %46, %cst_20 {dimension_numbers = #tpu.dot_dimension_numbers<[2], [2], [1], [1], [0, 0, 0, 1, 1, 1], [0], [0]>} : vector<2x8x8xf32>, vector<2x8x8xf32>, vector<2x8x8xf32> -> vector<2x8x8xf32>
    "tpu.trace_stop"() : () -> ()
    %48 = vector.extract_strided_slice %42 {offsets = [0, 0, 8], sizes = [2, 8, 8], strides = [1, 1, 1]} : vector<2x8x32xf32> to vector<2x8x8xf32>
    %49 = vector.extract_strided_slice %43 {offsets = [0, 0, 8], sizes = [2, 8, 8], strides = [1, 1, 1]} : vector<2x8x32xf32> to vector<2x8x8xf32>
    "tpu.trace_start"() <{level = 10 : i32, message = "bqd,bkd->bqk"}> : () -> ()
    %cst_21 = arith.constant dense<0.000000e+00> : vector<2x8x8xf32>
    %50 = tpu.matmul %48, %49, %cst_21 {dimension_numbers = #tpu.dot_dimension_numbers<[2], [2], [1], [1], [0, 0, 0, 1, 1, 1], [0], [0]>} : vector<2x8x8xf32>, vector<2x8x8xf32>, vector<2x8x8xf32> -> vector<2x8x8xf32>
    "tpu.trace_stop"() : () -> ()
    %51 = vector.extract_strided_slice %42 {offsets = [0, 0, 16], sizes = [2, 8, 8], strides = [1, 1, 1]} : vector<2x8x32xf32> to vector<2x8x8xf32>
    %52 = vector.extract_strided_slice %43 {offsets = [0, 0, 16], sizes = [2, 8, 8], strides = [1, 1, 1]} : vector<2x8x32xf32> to vector<2x8x8xf32>
    "tpu.trace_start"() <{level = 10 : i32, message = "bqd,bkd->bqk"}> : () -> ()
    %cst_22 = arith.constant dense<0.000000e+00> : vector<2x8x8xf32>
    %53 = tpu.matmul %51, %52, %cst_22 {dimension_numbers = #tpu.dot_dimension_numbers<[2], [2], [1], [1], [0, 0, 0, 1, 1, 1], [0], [0]>} : vector<2x8x8xf32>, vector<2x8x8xf32>, vector<2x8x8xf32> -> vector<2x8x8xf32>
    "tpu.trace_stop"() : () -> ()
    %54 = vector.extract_strided_slice %42 {offsets = [0, 0, 24], sizes = [2, 8, 8], strides = [1, 1, 1]} : vector<2x8x32xf32> to vector<2x8x8xf32>
    %55 = vector.extract_strided_slice %43 {offsets = [0, 0, 24], sizes = [2, 8, 8], strides = [1, 1, 1]} : vector<2x8x32xf32> to vector<2x8x8xf32>
    "tpu.trace_start"() <{level = 10 : i32, message = "bqd,bkd->bqk"}> : () -> ()
    %cst_23 = arith.constant dense<0.000000e+00> : vector<2x8x8xf32>
    %56 = tpu.matmul %54, %55, %cst_23 {dimension_numbers = #tpu.dot_dimension_numbers<[2], [2], [1], [1], [0, 0, 0, 1, 1, 1], [0], [0]>} : vector<2x8x8xf32>, vector<2x8x8xf32>, vector<2x8x8xf32> -> vector<2x8x8xf32>
    "tpu.trace_stop"() : () -> ()
    %57 = vector.shape_cast %47 : vector<2x8x8xf32> to vector<1x2x8x8xf32>
    %58 = vector.shape_cast %50 : vector<2x8x8xf32> to vector<1x2x8x8xf32>
    %59 = vector.shape_cast %53 : vector<2x8x8xf32> to vector<1x2x8x8xf32>
    %60 = vector.shape_cast %56 : vector<2x8x8xf32> to vector<1x2x8x8xf32>
    %61 = tpu.concatenate %57, %58, %59, %60 in 0 : vector<1x2x8x8xf32>, vector<1x2x8x8xf32>, vector<1x2x8x8xf32>, vector<1x2x8x8xf32> -> vector<4x2x8x8xf32>
    %62 = vector.shape_cast %17 : vector<2x1x8xf32> to vector<1x2x1x8xf32>
    %63 = vector.broadcast %62 : vector<1x2x1x8xf32> to vector<4x2x8x8xf32>
    %64 = arith.addf %61, %63 : vector<4x2x8x8xf32>
    %cst_24 = arith.constant dense<0xFF800000> : vector<4x2x8xf32>
    %65 = vector.multi_reduction <maximumf>, %64, %cst_24 [3] : vector<4x2x8x8xf32> to vector<4x2x8xf32>
    %66 = vector.shape_cast %65 : vector<4x2x8xf32> to vector<4x2x8x1xf32>
    %67 = vector.broadcast %66 : vector<4x2x8x1xf32> to vector<4x2x8x8xf32>
    %68 = arith.subf %64, %67 : vector<4x2x8x8xf32>
    %69 = math.exp %68 : vector<4x2x8x8xf32>
    %cst_25 = arith.constant dense<0.000000e+00> : vector<4x2x8xf32>
    %70 = vector.multi_reduction <add>, %69, %cst_25 [3] : vector<4x2x8x8xf32> to vector<4x2x8xf32>
    %71 = vector.shape_cast %70 : vector<4x2x8xf32> to vector<4x2x8x1xf32>
    %72 = tpu.reciprocal %71 {approx = true} : vector<4x2x8x1xf32> -> vector<4x2x8x1xf32>
    %73 = vector.broadcast %72 : vector<4x2x8x1xf32> to vector<4x2x8x8xf32>
    %74 = arith.mulf %69, %73 : vector<4x2x8x8xf32>
    %75 = vector.broadcast %2 : vector<1x32xf32> to vector<16x32xf32>
    %76 = arith.addf %11, %75 : vector<16x32xf32>
    %77 = vector.extract_strided_slice %44 {offsets = [0, 0, 0], sizes = [2, 8, 8], strides = [1, 1, 1]} : vector<2x8x32xf32> to vector<2x8x8xf32>
    %78 = vector.extract_strided_slice %74 {offsets = [0, 0, 0, 0], sizes = [1, 2, 8, 8], strides = [1, 1, 1, 1]} : vector<4x2x8x8xf32> to vector<1x2x8x8xf32>
    %79 = vector.shape_cast %78 : vector<1x2x8x8xf32> to vector<2x8x8xf32>
    "tpu.trace_start"() <{level = 10 : i32, message = "bqk,bkd->bqd"}> : () -> ()
    %cst_26 = arith.constant dense<0.000000e+00> : vector<2x8x8xf32>
    %80 = tpu.matmul %79, %77, %cst_26 {dimension_numbers = #tpu.dot_dimension_numbers<[2], [1], [1], [2], [0, 0, 0, 1, 1, 2], [0], [0]>} : vector<2x8x8xf32>, vector<2x8x8xf32>, vector<2x8x8xf32> -> vector<2x8x8xf32>
    "tpu.trace_stop"() : () -> ()
    %81 = vector.shape_cast %80 : vector<2x8x8xf32> to vector<16x8xf32>
    %82 = vector.extract_strided_slice %7 {offsets = [0, 0], sizes = [8, 32], strides = [1, 1]} : vector<32x32xf32> to vector<8x32xf32>
    %cst_27 = arith.constant dense<0.000000e+00> : vector<16x32xf32>
    %83 = tpu.matmul %81, %82, %cst_27 {dimension_numbers = #tpu.dot_dimension_numbers<[1], [0], [0], [1], [0, 0, 1, 1], [], []>} : vector<16x8xf32>, vector<8x32xf32>, vector<16x32xf32> -> vector<16x32xf32>
    %84 = arith.addf %76, %83 : vector<16x32xf32>
    %85 = vector.extract_strided_slice %44 {offsets = [0, 0, 8], sizes = [2, 8, 8], strides = [1, 1, 1]} : vector<2x8x32xf32> to vector<2x8x8xf32>
    %86 = vector.extract_strided_slice %74 {offsets = [1, 0, 0, 0], sizes = [1, 2, 8, 8], strides = [1, 1, 1, 1]} : vector<4x2x8x8xf32> to vector<1x2x8x8xf32>
    %87 = vector.shape_cast %86 : vector<1x2x8x8xf32> to vector<2x8x8xf32>
    "tpu.trace_start"() <{level = 10 : i32, message = "bqk,bkd->bqd"}> : () -> ()
    %cst_28 = arith.constant dense<0.000000e+00> : vector<2x8x8xf32>
    %88 = tpu.matmul %87, %85, %cst_28 {dimension_numbers = #tpu.dot_dimension_numbers<[2], [1], [1], [2], [0, 0, 0, 1, 1, 2], [0], [0]>} : vector<2x8x8xf32>, vector<2x8x8xf32>, vector<2x8x8xf32> -> vector<2x8x8xf32>
    "tpu.trace_stop"() : () -> ()
    %89 = vector.shape_cast %88 : vector<2x8x8xf32> to vector<16x8xf32>
    %90 = vector.extract_strided_slice %7 {offsets = [8, 0], sizes = [8, 32], strides = [1, 1]} : vector<32x32xf32> to vector<8x32xf32>
    %cst_29 = arith.constant dense<0.000000e+00> : vector<16x32xf32>
    %91 = tpu.matmul %89, %90, %cst_29 {dimension_numbers = #tpu.dot_dimension_numbers<[1], [0], [0], [1], [0, 0, 1, 1], [], []>} : vector<16x8xf32>, vector<8x32xf32>, vector<16x32xf32> -> vector<16x32xf32>
    %92 = arith.addf %84, %91 : vector<16x32xf32>
    %93 = vector.extract_strided_slice %44 {offsets = [0, 0, 16], sizes = [2, 8, 8], strides = [1, 1, 1]} : vector<2x8x32xf32> to vector<2x8x8xf32>
    %94 = vector.extract_strided_slice %74 {offsets = [2, 0, 0, 0], sizes = [1, 2, 8, 8], strides = [1, 1, 1, 1]} : vector<4x2x8x8xf32> to vector<1x2x8x8xf32>
    %95 = vector.shape_cast %94 : vector<1x2x8x8xf32> to vector<2x8x8xf32>
    "tpu.trace_start"() <{level = 10 : i32, message = "bqk,bkd->bqd"}> : () -> ()
    %cst_30 = arith.constant dense<0.000000e+00> : vector<2x8x8xf32>
    %96 = tpu.matmul %95, %93, %cst_30 {dimension_numbers = #tpu.dot_dimension_numbers<[2], [1], [1], [2], [0, 0, 0, 1, 1, 2], [0], [0]>} : vector<2x8x8xf32>, vector<2x8x8xf32>, vector<2x8x8xf32> -> vector<2x8x8xf32>
    "tpu.trace_stop"() : () -> ()
    %97 = vector.shape_cast %96 : vector<2x8x8xf32> to vector<16x8xf32>
    %98 = vector.extract_strided_slice %7 {offsets = [16, 0], sizes = [8, 32], strides = [1, 1]} : vector<32x32xf32> to vector<8x32xf32>
    %cst_31 = arith.constant dense<0.000000e+00> : vector<16x32xf32>
    %99 = tpu.matmul %97, %98, %cst_31 {dimension_numbers = #tpu.dot_dimension_numbers<[1], [0], [0], [1], [0, 0, 1, 1], [], []>} : vector<16x8xf32>, vector<8x32xf32>, vector<16x32xf32> -> vector<16x32xf32>
    %100 = arith.addf %92, %99 : vector<16x32xf32>
    %101 = vector.extract_strided_slice %44 {offsets = [0, 0, 24], sizes = [2, 8, 8], strides = [1, 1, 1]} : vector<2x8x32xf32> to vector<2x8x8xf32>
    %102 = vector.extract_strided_slice %74 {offsets = [3, 0, 0, 0], sizes = [1, 2, 8, 8], strides = [1, 1, 1, 1]} : vector<4x2x8x8xf32> to vector<1x2x8x8xf32>
    %103 = vector.shape_cast %102 : vector<1x2x8x8xf32> to vector<2x8x8xf32>
    "tpu.trace_start"() <{level = 10 : i32, message = "bqk,bkd->bqd"}> : () -> ()
    %cst_32 = arith.constant dense<0.000000e+00> : vector<2x8x8xf32>
    %104 = tpu.matmul %103, %101, %cst_32 {dimension_numbers = #tpu.dot_dimension_numbers<[2], [1], [1], [2], [0, 0, 0, 1, 1, 2], [0], [0]>} : vector<2x8x8xf32>, vector<2x8x8xf32>, vector<2x8x8xf32> -> vector<2x8x8xf32>
    "tpu.trace_stop"() : () -> ()
    %105 = vector.shape_cast %104 : vector<2x8x8xf32> to vector<16x8xf32>
    %106 = vector.extract_strided_slice %7 {offsets = [24, 0], sizes = [8, 32], strides = [1, 1]} : vector<32x32xf32> to vector<8x32xf32>
    %cst_33 = arith.constant dense<0.000000e+00> : vector<16x32xf32>
    %107 = tpu.matmul %105, %106, %cst_33 {dimension_numbers = #tpu.dot_dimension_numbers<[1], [0], [0], [1], [0, 0, 1, 1], [], []>} : vector<16x8xf32>, vector<8x32xf32>, vector<16x32xf32> -> vector<16x32xf32>
    %108 = arith.addf %100, %107 : vector<16x32xf32>
    %cst_34 = arith.constant dense<0.000000e+00> : vector<16xf32>
    %109 = vector.multi_reduction <add>, %108, %cst_34 [1] : vector<16x32xf32> to vector<16xf32>
    %110 = vector.shape_cast %109 : vector<16xf32> to vector<16x1xf32>
    %cst_35 = arith.constant 3.200000e+01 : f32
    %111 = vector.broadcast %cst_35 : f32 to vector<16x1xf32>
    %112 = arith.divf %110, %111 : vector<16x1xf32>
    %113 = vector.broadcast %112 : vector<16x1xf32> to vector<16x32xf32>
    %114 = arith.subf %108, %113 : vector<16x32xf32>
    %115 = arith.mulf %114, %114 : vector<16x32xf32>
    %cst_36 = arith.constant dense<0.000000e+00> : vector<16xf32>
    %116 = vector.multi_reduction <add>, %115, %cst_36 [1] : vector<16x32xf32> to vector<16xf32>
    %117 = vector.shape_cast %116 : vector<16xf32> to vector<16x1xf32>
    %cst_37 = arith.constant 0.0322580636 : f32
    %118 = vector.broadcast %cst_37 : f32 to vector<16x1xf32>
    %119 = arith.mulf %117, %118 : vector<16x1xf32>
    %120 = math.sqrt %119 : vector<16x1xf32>
    %cst_38 = arith.constant 9.99999997E-7 : f32
    %121 = vector.broadcast %cst_38 : f32 to vector<16x1xf32>
    %122 = arith.addf %120, %121 : vector<16x1xf32>
    %cst_39 = arith.constant 1.000000e+00 : f32
    %123 = vector.broadcast %cst_39 : f32 to vector<16x1xf32>
    %124 = arith.divf %123, %122 : vector<16x1xf32>
    %125 = vector.broadcast %112 : vector<16x1xf32> to vector<16x32xf32>
    %126 = arith.subf %108, %125 : vector<16x32xf32>
    %127 = vector.broadcast %124 : vector<16x1xf32> to vector<16x32xf32>
    %128 = arith.mulf %126, %127 : vector<16x32xf32>
    %cst_40 = arith.constant dense<0.000000e+00> : vector<16x64xf32>
    %129 = tpu.matmul %128, %8, %cst_40 {dimension_numbers = #tpu.dot_dimension_numbers<[1], [0], [0], [1], [0, 0, 1, 1], [], []>} : vector<16x32xf32>, vector<32x64xf32>, vector<16x64xf32> -> vector<16x64xf32>
    %130 = vector.broadcast %3 : vector<1x64xf32> to vector<16x64xf32>
    %131 = arith.addf %129, %130 : vector<16x64xf32>
    %cst_41 = arith.constant 0.000000e+00 : f32
    %132 = vector.broadcast %cst_41 : f32 to vector<16x64xf32>
    %133 = arith.maximumf %131, %132 : vector<16x64xf32>
    %cst_42 = arith.constant dense<0.000000e+00> : vector<16x32xf32>
    %134 = tpu.matmul %133, %9, %cst_42 {dimension_numbers = #tpu.dot_dimension_numbers<[1], [0], [0], [1], [0, 0, 1, 1], [], []>} : vector<16x64xf32>, vector<64x32xf32>, vector<16x32xf32> -> vector<16x32xf32>
    %135 = vector.broadcast %4 : vector<1x32xf32> to vector<16x32xf32>
    %136 = arith.addf %134, %135 : vector<16x32xf32>
    %137 = arith.addf %136, %108 : vector<16x32xf32>
    %138 = vector.shape_cast %137 : vector<16x32xf32> to vector<2x8x32xf32>
    %c0_43 = arith.constant 0 : index
    %c0_44 = arith.constant 0 : index
    %c0_45 = arith.constant 0 : index
    %139 = vector.load %arg6[%c0_43, %c0_44, %c0_45] : memref<2x8x32xf32, #tpu.memory_space<vmem>>, vector<2x8x32xf32>
    tpu.vector_store %arg6[%c0_43, %c0_44, %c0_45], %138 {strides = array<i32>} : memref<2x8x32xf32, #tpu.memory_space<vmem>>, vector<2x8x32xf32>,
    return
  }
  func.func @transform_0(%arg0: i32) -> (i32, i32, i32) {
    %c0_i32 = arith.constant 0 : i32
    %c0_i32_0 = arith.constant 0 : i32
    %c0_i32_1 = arith.constant 0 : i32
    return %arg0, %c0_i32, %c0_i32_0 : i32, i32, i32
  }
  func.func @transform_1(%arg0: i32) -> (i32, i32, i32) {
    %c0_i32 = arith.constant 0 : i32
    %c0_i32_0 = arith.constant 0 : i32
    %c0_i32_1 = arith.constant 0 : i32
    return %arg0, %c0_i32, %c0_i32_0 : i32, i32, i32
  }
  func.func @transform_2(%arg0: i32) -> (i32, i32) {
    %c0_i32 = arith.constant 0 : i32
    %c0_i32_0 = arith.constant 0 : i32
    %c0_i32_1 = arith.constant 0 : i32
    return %c0_i32, %c0_i32_0 : i32, i32
  }
  func.func @transform_3(%arg0: i32) -> (i32, i32) {
    %c0_i32 = arith.constant 0 : i32
    %c0_i32_0 = arith.constant 0 : i32
    %c0_i32_1 = arith.constant 0 : i32
    return %c0_i32, %c0_i32_0 : i32, i32
  }
  func.func @transform_4(%arg0: i32) -> (i32, i32) {
    %c0_i32 = arith.constant 0 : i32
    %c0_i32_0 = arith.constant 0 : i32
    %c0_i32_1 = arith.constant 0 : i32
    return %c0_i32, %c0_i32_0 : i32, i32
  }
  func.func @transform_5(%arg0: i32) -> (i32, i32, i32) {
    %c0_i32 = arith.constant 0 : i32
    %c0_i32_0 = arith.constant 0 : i32
    %c0_i32_1 = arith.constant 0 : i32
    return %arg0, %c0_i32, %c0_i32_0 : i32, i32, i32
  }
}

</mosaic_0001>

<bundles_post_ra>
// kernel: tpu_custom_call.1
= control target key start
LH: loop header
LB: loop body
LE: loop exit
PB: predicated region body
PF: predicated region fallthrough
CT: control target
= control target key end

     0   :  { %s2128_s0 = inlined_call_operand.vmem [shape: f32[4,8,32], index: 0, kind: input, shape index: {}]   ;;  %s2129_s1 = inlined_call_operand.hbm [shape: f32[4,1,8], index: 1, kind: input, shape index: {}]   ;;  %s2130_s2 = inlined_call_operand.vmem [shape: f32[32,192], index: 2, kind: input, shape index: {}]   ;;  %s2131_s3 = inlined_call_operand.vmem [shape: f32[64,32], index: 3, kind: input, shape index: {}]   ;;  %s2132_s4 = inlined_call_operand.hbm [shape: f32[8,128], index: 4, kind: input, shape index: {}]   ;;  %s2133_s5 = inlined_call_operand.hbm [shape: f32[4,8,32], index: 5, kind: output, shape index: {}]  }
   0x1   :  { %2134 = sst [smem:[#allocation12_spill]] %s2132_s4 }
   0x2   :  { %10 = vsyncpa [#allocation3], 0 }
   0x3   :  { %12 = vsyncpa [#allocation3 + $0x1], 0 }
   0x4   :  { %13 = vsyncpa [#allocation6], 0 }
   0x5   :  { %14 = vsyncpa [#allocation4], 0 }
   0x6   :  { %16 = vsyncpa [#allocation4 + $0x1], 0  ;;  %s1743_s18 = smov 0   ;;  %s1745_s19 = smov 0  }
   0x7   :  { %s1747_s20 = smov 0   ;;  %s1749_s21 = smov 0  }
   0x8 LB: > { %s1764_s22 = sadd.s32 4294967295, %s1692_s21   ;;  %s1356_s23 = sadd.s32 4294967294, %s1692_s21   ;;  %s1692_s21 = sphi %s1749_s21, %s2148_s21   ;;  %s1688_s20 = sphi %s1747_s20, %s2147_s20   ;;  %s1684_s19 = sphi %s1745_s19, %s2146_s19   ;;  %s1680_s18 = sphi %s1743_s18, %s2145_s18  }
   0x9   : > { %s1768_s24 = sadd.s32 1, %s1692_s21   ;;  %s55_s25 = sadd.s32 1, %s1688_s20 }
   0xa   : > { %s52_s26 = ssub.s32 %s1692_s21, %s1768_s24  ;;  %p62_p0 = scmp.ne.s32.totalorder %s1688_s20, %s1684_s19 }
   0xb   : > { %p53_p1 = scmp.eq.s32.totalorder %s52_s26, 0  ;;  %p63_p2 = scmp.eq.s32.totalorder %s1692_s21, 0 }
   0xc   : > { %p68_p3 = scmp.ne.s32.totalorder %s1684_s19, %s1680_s18  ;;  %p69_p4 = scmp.eq.s32.totalorder %s1764_s22, 0 }
   0xd   : > { %s1780_s27 = scalar_select %p53_p1, %s1688_s20, %s55_s25  }
   0xe   : > { %p1782_p5 = por %p63_p2, %p62_p0  ;;  %p1788_p6 = por %p69_p4, %p68_p3 }
   0xf   : > { %2135 = sst [smem:[#allocation11_spill]] %s1780_s27  ;;  %p155_p7 = scmp.eq.s32.totalorder %s1764_s22, 1 }
  0x10   : > { %p161_p8 = scmp.eq.s32.totalorder %s1356_s23, 1  ;;  %p1357_p9 = scmp.ge.s32.totalorder %s1692_s21, 1 }
  0x11   : > { %p168_p10 = scmp.lt.s32.totalorder %s1692_s21, 3  ;;  %p1795_p11 = por %p155_p7, %p62_p0 }
  0x12   : > { %p1799_p12 = por %p161_p8, %p68_p3  ;;  %s2141_s4 = sld [smem:[#allocation12_spill]] }
  0x13   : > { %p1803_p13 = pnand %p1357_p9, %p168_p10  ;;  %s1694_s11 = smov [#allocation5]  }
  0x14   : > { %s188_s12 = sshll.u32 %s1694_s11, 4  ;;  %p1433_p3 = scmp.lt.s32.totalorder %s1692_s21, 2  ;;  %s189_s12 = int_to_ptr.vmem [resolvable:$true] %s188_s12 }
  0x15   : > { %p1420_p1 = pneg %p1803_p13  ;;  %s208_s13 = sand.u32 1, %s1688_s20  }
  0x16   : > { %p1819_p7 = pnand %p1433_p3, %p1782_p5  ;;  %s1360_s15 = sshll.u32 %s208_s13, 1 }
  0x17   : > { %p1421_p2 = pnand %p1420_p1, %p69_p4  ;;  %s1361_s16 = sshll.u32 %s1692_s21, 1 }
  0x18   : > { %s186_s10 = sshll.u32 %s2141_s4, 4  ;;  %s216_s25 = scalar_lea.hbm %s2129_s1, %s1361_s16  ;;  %s187_s10 = int_to_ptr.hbm [resolvable:$true] %s186_s10 }
  0x19   : > { %1423 = dma.hbm_to_vmem [thread:$0]  (!%p1421_p2), %s187_s10, 128, %s189_s12, [#allocation6]  }
  0x1a   : > { %s217_s26 = sshll.u32 %s216_s25, 4  ;;  %s212_s8 = scalar_lea.vmem [#allocation2], %s1360_s15  ;;  %s218_s26 = int_to_ptr.hbm [resolvable:$true] %s217_s26 }
  0x1b   : > { %s219_s9 = sshll.u32 %s212_s8, 4  ;;  %s209_s11 = scalar_lea.sflag [#allocation3], %s208_s13  ;;  %s220_s9 = int_to_ptr.vmem [resolvable:$true] %s219_s9 }
  0x1c   : > { %s1592_s4 = sshra.s32 %s218_s26, 4  ;;  %p1596_p8 = pneg %p1819_p7  ;;  %s1593_s4 = int_to_ptr.hbm [resolvable:$true] %s1592_s4 }
  0x1d   : > { %s1594_s28 = scalar_lea.hbm %s1593_s4, 2  ;;  %s1599_s27 = scalar_lea.hbm %s2129_s1, 4 }
  0x1e   : > { %p1595_p5 = scmp.ne.s32.totalorder %s1593_s4, %s1594_s28  ;;  %p1600_p1 = scmp.lt.s32.totalorder %s1593_s4, %s2129_s1 }
  0x1f   : > { %p1601_p2 = scmp.lt.s32.totalorder %s1599_s27, %s1594_s28 }
  0x20   : > { %p1597_p9 = pnand %p1596_p8, %p1595_p5 }
  0x21   : > { %p1602_p3 = por %p1601_p2, %p1600_p1 }
  0x22   : > { %p1598_p10 = pneg %p1597_p9 }
  0x24   : > { %p1603_p0 = pnand %p1602_p3, %p1598_p10 }
  0x26   : > { %1606 = shalt.err (!%p1603_p0)
}
  0x27   : > { %s1695_s13 = smov 16   ;;  %s1696_s15 = smov 1  }
  0x28   : > { %1427 = dma.hbm_to_vmem [thread:$0]  (!%p1819_p7), %s218_s26, 32, %s220_s9, %s209_s11, %s1695_s13, %s1695_s13, %s1696_s15  }
  0x29   : > { %231 = sbr.rel (%p1803_p13) target bundleno = 1878 (0x756), region = 40  ;;  %s1840_s23 = sand.u32 (!%p1803_p13), 1, %s1684_s19  }
  0x2a   : > { %s1363_s25 = sshll.u32 (!%p1803_p13), %s1840_s23, 1  ;;  %s234_s4 = scalar_lea.sflag (!%p1803_p13), [#allocation3], %s1840_s23 }
  0x2b   : > { %s1844_s27 = scalar_lea.vmem (!%p1803_p13), [#allocation2], %s1363_s25 }
  0x2e   : > { %1667 = dma.done.wait (%p1788_p6), %s234_s4, 32  }
  0x2f   : > { %1669 = vsyncadd (%p1788_p6), %s234_s4, 4294967264 }
  0x30   : > { %1671 = dma.done.wait (%p69_p4), [#allocation6], 128  }
  0x31   : > { %1673 = vsyncadd (%p69_p4), [#allocation6], 4294967168  ;;  %s1366_s7 = sshll.u32 %s1764_s22, 1  ;;  %vm308_vm0 = vcmask 261120   ;;  %v1697_v4 = vmov 32.0   ;;  %v1885_v21 = vld [vmem:[%s2130_s2 + $0x30] sm:$0xff] }
  0x32   : > { %p276_p13 = scmp.lt.s32.totalorder %s1366_s7, 3  ;;  %1512 = vrcp.f32 %v1697_v4  ;;  %v1890_v22 = vld [vmem:[%s2130_s2 + $0x20] sm:$0xff]  ;;  %413 = vmatpush.msra.mxu0 %v1885_v21  ;;  %v1898_v24 = vld [vmem:[%s2130_s2 + $0x10] sm:$0xff]  ;;  %s1698_s15 = smov 120   ;;  %vm427_vm14 = vcmask 64512  }
  0x33   : > { %v1507_v23 = vpack.i.bf16 %v1885_v21, %v1890_v22  ;;  %v1903_v25 = vld [vmem:[%s2130_s2] sm:$0xff]  ;;  %s1699_s25 = smov 88   ;;  %s1700_s4 = smov 96  }
  0x34   : > { %s2150_s7 = smov (!%p276_p13, %s1366_s7), 3  ;;  %v1502_v26 = vpack.i.bf16 %v1898_v24, %v1903_v25  ;;  %414 = vmatpush.msra.mxu0 %v1890_v22  ;;  %s1703_s26 = smov 104  }
  0x35   : > { %s1367_s14 = sshll.u32 %s2150_s7, 3  ;;  %s1701_s7 = smov 112  }
  0x36   : > { %s279_s9 = scalar_lea.vmem %s2128_s0, %s1367_s14  ;;  %415 = vmatpush.msra.mxu0 %v1898_v24  ;;  %s1702_s14 = smov 80  }
  0x37   : > { %v1858_v0 = vld [vmem:[%s279_s9] sm:$0xff]  ;;  %v1862_v2 = vld [vmem:[%s279_s9 + $0x8] sm:$0xff]  ;;  %s1704_s8 = smov 72   ;;  %s1707_s9 = smov 56  }
  0x38   : > { %v309_v1 = vsel %vm308_vm0, %v1858_v0, 0.0  ;;  %v312_v3 = vsel %vm308_vm0, %v1862_v2, 0.0  ;;  %v1513_v5 = vpop.eup %1512  ;;  %416 = vmatpush.msra.mxu0 %v1903_v25  ;;  %s1708_s29 = smov 48   ;;  %s1709_s11 = smov 32  }
  0x39   : > { %310 = vadd.xlane.f32.xlu0 %v309_v1  ;;  %v316_v6 = vmul.f32 32.0, %v1513_v5  ;;  %vm320_vm1 = vweird.f32 %v1513_v5  ;;  %s1710_s28 = smov 40   ;;  %s1642_s17 = scalar_lea.hbm %s2133_s5, 32 }
  0x3b   : > { %v317_v7 = vsub.f32 1.0, %v316_v6 }
  0x3d   : > { %v318_v8 = vmul.f32 %v1513_v5, %v317_v7 }
  0x3f   : > { %v319_v9 = vadd.f32 %v1513_v5, %v318_v8 }
  0x41   : > { %313 = vadd.xlane.f32.xlu0 %v312_v3  ;;  %v1866_v10 = vsel %vm320_vm1, %v1513_v5, %v319_v9 }
  0xac   : > { %v311_v11 = vpop.xlane.xlu0 %310 }
  0xad   : > { %v322_v12 = vmul.f32 %v1866_v10, %v311_v11 }
  0xaf   : > { %v1870_v13 = vsub.f32 %v1858_v0, %v322_v12 }
  0xb1   : > { %v326_v14 = vmul.f32 %v1870_v13, %v1870_v13 }
  0xb3   : > { %v328_v15 = vsel %vm308_vm0, %v326_v14, 0.0 }
  0xb4   : > { %329 = vadd.xlane.f32.xlu1 %v328_v15  ;;  %v314_v16 = vpop.xlane.xlu0 %313  ;;  %v1914_v15 = vld [vmem:[#allocation5] sm:$0xff] }
  0xb5   : > { %v323_v17 = vmul.f32 %v1866_v10, %v314_v16 }
  0xb7   : > { %v1877_v18 = vsub.f32 %v1862_v2, %v323_v17 }
  0xb9   : > { %v327_v19 = vmul.f32 %v1877_v18, %v1877_v18 }
  0xbb   : > { %v331_v20 = vsel %vm308_vm0, %v327_v19, 0.0 }
  0xbc   : > { %332 = vadd.xlane.f32.xlu1 %v331_v20 }
 0x127   : > { %v330_v27 = vpop.xlane.xlu1 %329 }
 0x128   : > { %v334_v28 = vmul.f32 0.032258064, %v330_v27 }
 0x12a   : > { %1514 = vrsqrt.f32 %v334_v28  ;;  %vm343_vm2 = vcmp.eq.f32.partialorder %v334_v28, inf  ;;  %v346_v41 = vand.u32 2147483648, %v334_v28  ;;  %vm345_vm3 = vcmp.eq.f32.partialorder %v334_v28, 0.0 }
 0x12f   : > { %v333_v29 = vpop.xlane.xlu1 %332 }
 0x130   : > { %v1515_v30 = vpop.eup %1514  ;;  %v335_v31 = vmul.f32 0.032258064, %v333_v29 }
 0x131   : > { %v337_v32 = vmul.f32 %v1515_v30, %v334_v28 }
 0x132   : > { %1516 = vrsqrt.f32 %v335_v31  ;;  %vm355_vm4 = vcmp.eq.f32.partialorder %v335_v31, inf  ;;  %v358_v48 = vand.u32 2147483648, %v335_v31  ;;  %vm357_vm5 = vcmp.eq.f32.partialorder %v335_v31, 0.0 }
 0x133   : > { %v338_v33 = vmul.f32 %v1515_v30, %v337_v32 }
 0x135   : > { %v339_v34 = vmul.f32 0.5, %v338_v33 }
 0x137   : > { %v340_v35 = vsub.f32 1.5, %v339_v34 }
 0x138   : > { %v1517_v36 = vpop.eup %1516 }
 0x139   : > { %v341_v37 = vmul.f32 %v1515_v30, %v340_v35  ;;  %v349_v38 = vmul.f32 %v1517_v36, %v335_v31 }
 0x13b   : > { %v342_v39 = vmul.f32 %v341_v37, %v334_v28  ;;  %v350_v40 = vmul.f32 %v1517_v36, %v349_v38 }
 0x13d   : > { %v351_v42 = vmul.f32 0.5, %v350_v40  ;;  %v344_v43 = vsel %vm343_vm2, %v334_v28, %v342_v39  ;;  %v302_v40 = vld [vmem:[%s1844_s27] sm:$0x1] }
 0x13e   : > { %v347_v44 = vsel %vm345_vm3, %v346_v41, %v344_v43  ;;  %vm304_vm15 = vcmp.gt.f32.partialorder %v302_v40, 0.0  ;;  %v1705_v41 = vmov 0.0  }
 0x13f   : > { %v352_v45 = vsub.f32 1.5, %v351_v42  ;;  %v360_v46 = vadd.f32 1e-06, %v347_v44  ;;  %v306_v42 = vsel %vm304_vm15, -1e+18, %v1705_v41 }
 0x140   : > { %v649_v43 = vperm.slane %v306_v42, 0 }
 0x141   : > { %v353_v47 = vmul.f32 %v1517_v36, %v352_v45  ;;  %1518 = vrcp.f32 %v360_v46  ;;  %v373_v56 = vand.u32 2147483648, %v360_v46  ;;  %v371_v58 = vand.u32 2147483647, %v360_v46 }
 0x142   : > { %vm367_vm7 = vweird.f32 %v360_v46 }
 0x143   : > { %v354_v49 = vmul.f32 %v353_v47, %v335_v31  ;;  %v374_v61 = vor.u32 1.1754944e-38, %v373_v56  ;;  %vm372_vm9 = vcmp.eq.f32.partialorder %v371_v58, 8.507059e+37  ;;  %v303_v47 = vld [vmem:[%s1844_s27 + $0x1] sm:$0x1]  ;;  %s1706_s27 = smov 64  }
 0x144   : > { %vm305_vm1 = vcmp.gt.f32.partialorder %v303_v47, 0.0 }
 0x145   : > { %v356_v50 = vsel %vm355_vm4, %v335_v31, %v354_v49 }
 0x146   : > { %v359_v51 = vsel %vm357_vm5, %v358_v48, %v356_v50  ;;  %v307_v48 = vsel %vm305_vm1, -1e+18, %v1705_v41 }
 0x147   : > { %v1519_v52 = vpop.eup %1518  ;;  %v361_v53 = vadd.f32 1e-06, %v359_v51  ;;  %v650_v51 = vperm.slane %v307_v48, 0 }
 0x148   : > { %v363_v54 = vmul.f32 %v1519_v52, %v360_v46  ;;  %vm368_vm6 = vweird.f32 %v1519_v52 }
 0x149   : > { %1520 = vrcp.f32 %v361_v53  ;;  %vm369_vm8 = vmor %vm367_vm7, %vm368_vm6  ;;  %v388_v5 = vand.u32 2147483648, %v361_v53  ;;  %v386_v7 = vand.u32 2147483647, %v361_v53  ;;  %vm382_vm11 = vweird.f32 %v361_v53 }
 0x14a   : > { %v364_v55 = vsub.f32 1.0, %v363_v54 }
 0x14b   : > { %v389_v9 = vor.u32 1.1754944e-38, %v388_v5  ;;  %vm387_vm13 = vcmp.eq.f32.partialorder %v386_v7, 8.507059e+37 }
 0x14c   : > { %v365_v57 = vmul.f32 %v1519_v52, %v364_v55 }
 0x14e   : > { %v366_v59 = vadd.f32 %v1519_v52, %v365_v57 }
 0x14f   : > { %v1521_v60 = vpop.eup %1520 }
 0x150   : > { %v370_v62 = vsel %vm369_vm8, %v1519_v52, %v366_v59  ;;  %v378_v63 = vmul.f32 %v1521_v60, %v361_v53  ;;  %vm383_vm10 = vweird.f32 %v1521_v60 }
 0x151   : > { %v375_v1 = vsel %vm372_vm9, %v374_v61, %v370_v62  ;;  %vm384_vm12 = vmor %vm382_vm11, %vm383_vm10 }
 0x152   : > { %v392_v3 = vmul.f32 %v375_v1, %v1870_v13  ;;  %v379_v4 = vsub.f32 1.0, %v378_v63  ;;  %v394_v13 = vperm.slane %v1914_v15, 0 }
 0x154   : > { %1368 = vmatmul.msk.f32.vlgmr.msra.gmra.mxu0 %vm308_vm0, %v392_v3  ;;  %v380_v6 = vmul.f32 %v1521_v60, %v379_v4 }
 0x156   : > { %v381_v8 = vadd.f32 %v1521_v60, %v380_v6 }
 0x158   : > { %v385_v11 = vsel %vm384_vm12, %v1521_v60, %v381_v8 }
 0x159   : > { %v390_v12 = vsel %vm387_vm13, %v389_v9, %v385_v11 }
 0x15a   : > { %v393_v14 = vmul.f32 %v390_v12, %v1877_v18 }
 0x15c   : > { %1369 = vmatmul.msk.f32.gmra.mxu0 %vm308_vm0, %v393_v14 }
 0x1d1   : > { %v418_v16 = vpop.f32.mrf.mxu0 }
 0x1d2   : > { %v1917_v17 = vadd.f32 %v418_v16, %v394_v13 }
 0x1d4   : > { %479 = vrot.lane.b32.xlu1 %v1917_v17, %s1698_s15  ;;  %481 = vrot.lane.b32.xlu0 %v1917_v17, %s1699_s25 }
 0x1d5   : > { %425 = vrot.lane.b32.xlu2 %v1917_v17, %s1700_s4 }
 0x1d9   : > { %v421_v19 = vpop.f32.mrf.mxu0 }
 0x1da   : > { %v1922_v18 = vadd.f32 %v421_v19, %v394_v13 }
 0x1dc   : > { %563 = vrot.lane.b32.xlu1 %v1922_v18, %s1701_s7  ;;  %565 = vrot.lane.b32.xlu0 %v1922_v18, %s1702_s14  ;;  %v1487_v9 = vpack.i.bf16 %v1922_v18, %v1917_v17 }
 0x1dd   : > { %537 = vrot.lane.b32.xlu2 %v1917_v17, %s1702_s14 }
 0x1e4   : > { %591 = vrot.lane.b32.xlu1 %v1917_v17, %s1703_s26  ;;  %593 = vrot.lane.b32.xlu0 %v1917_v17, %s1704_s8 }
 0x1e5   : > { %535 = vrot.lane.b32.xlu2 %v1917_v17, %s1701_s7  ;;  %s1411_s7 = sshll.u32 %s1764_s22, 4  ;;  %s1246_s22 = scalar_lea.sflag [#allocation4], %s1840_s23 }
 0x1ec   : > { %619 = vrot.lane.b32.xlu0 %v1922_v18, %s1703_s26 }
 0x1ed   : > { %453 = vrot.lane.b32.xlu2 %v1922_v18, %s1700_s4  ;;  %s1365_s4 = sshll.u32 %s1840_s23, 4 }
 0x1f5   : > { %509 = vrot.lane.b32.xlu2 %v1922_v18, %s1699_s25 }
 0x1fd   : > { %507 = vrot.lane.b32.xlu2 %v1922_v18, %s1698_s15 }
 0x205   : > { %621 = vrot.lane.b32.xlu2 %v1922_v18, %s1704_s8  ;;  %s1257_s8 = scalar_lea.hbm %s2133_s5, %s1411_s7 }
 0x22f   : > { %v426_v20 = vpop.permute.xlu2 %425 }
 0x230   : > { %1370 = vmatpush.xpose.msk.msra.mxu3 %vm427_vm14, %v426_v20 }
 0x233   : > { %1371 = vmatmul.msk.f32.vlgmr.msra.gmra.mxu3 %vm427_vm14, %v1917_v17 }
 0x237   : > { %v538_v27 = vpop.permute.xlu2 %537 }
 0x23f   : > { %v536_v28 = vpop.permute.xlu2 %535 }
 0x246   : > { %v482_v29 = vpop.permute.xlu0 %481  ;;  %v480_v30 = vpop.permute.xlu1 %479 }
 0x247   : > { %v454_v31 = vpop.permute.xlu2 %453  ;;  %1374 = vmatpush.xpose.msk.msrb.mxu3 %vm427_vm14, %v482_v29 }
 0x248   : > { %1372 = vmatpush.xpose.msk.msra.mxu2 %vm427_vm14, %v454_v31 }
 0x24a   : > { %1375 = vmatmul.msk.f32.vlgmr.msrb.gmra.mxu3 %vm427_vm14, %v480_v30 }
 0x24b   : > { %1373 = vmatmul.msk.f32.vlgmr.msra.gmra.mxu2 %vm427_vm14, %v1922_v18 }
 0x24c   : > { %1378 = vmatpush.xpose.msk.msrb.mxu2 %vm427_vm14, %v538_v27 }
 0x24e   : > { %v566_v32 = vpop.permute.xlu0 %565  ;;  %v564_v34 = vpop.permute.xlu1 %563 }
 0x24f   : > { %v510_v33 = vpop.permute.xlu2 %509  ;;  %1380 = vmatpush.xpose.msk.msra.mxu3 %vm427_vm14, %v566_v32 }
 0x250   : > { %1376 = vmatpush.xpose.msk.msra.mxu1 %vm427_vm14, %v510_v33 }
 0x252   : > { %1381 = vmatmul.msk.f32.vlgmr.msra.gmra.mxu3 %vm427_vm14, %v564_v34 }
 0x253   : > { %1379 = vmatmul.msk.f32.vlgmr.msrb.gmra.mxu2 %vm427_vm14, %v536_v28 }
 0x256   : > { %v594_v35 = vpop.permute.xlu0 %593  ;;  %v592_v37 = vpop.permute.xlu1 %591 }
 0x257   : > { %v508_v36 = vpop.permute.xlu2 %507  ;;  %1382 = vmatpush.xpose.msk.msrb.mxu1 %vm427_vm14, %v594_v35 }
 0x258   : > { %1377 = vmatmul.msk.f32.vlgmr.msra.gmra.mxu1 %vm427_vm14, %v508_v36 }
 0x25e   : > { %v620_v39 = vpop.permute.xlu0 %619 }
 0x25f   : > { %v622_v38 = vpop.permute.xlu2 %621 }
 0x260   : > { %1383 = vmatmul.msk.f32.vlgmr.msrb.gmra.mxu1 %vm427_vm14, %v592_v37  ;;  %1384 = vmatpush.xpose.msk.msra.mxu2 %vm427_vm14, %v622_v38 }
 0x263   : > { %1385 = vmatmul.msk.f32.vlgmr.msra.gmra.mxu2 %vm427_vm14, %v620_v39 }
 0x2b6   : > { %v449_v44 = vpop.f32.mrf.mxu3 }
 0x2b7   : > { %v653_v45 = vadd.f32 %v649_v43, %v449_v44 }
 0x2b9   : > { %v661_v46 = vsel %vm427_vm14, %v653_v45, -inf }
 0x2ba   : > { %662 = vmax.xlane.f32.xlu2 %v661_v46 }
 0x2cd   : > { %v504_v49 = vpop.f32.mrf.mxu3 }
 0x2ce   : > { %v655_v50 = vadd.f32 %v649_v43, %v504_v49  ;;  %v476_v53 = vpop.f32.mrf.mxu2 }
 0x2cf   : > { %v654_v54 = vadd.f32 %v650_v51, %v476_v53 }
 0x2d0   : > { %v667_v52 = vsel %vm427_vm14, %v655_v50, -inf }
 0x2d1   : > { %668 = vmax.xlane.f32.xlu1 %v667_v52  ;;  %v664_v58 = vsel %vm427_vm14, %v654_v54, -inf }
 0x2d5   : > { %v532_v55 = vpop.f32.mrf.mxu1  ;;  %v588_v59 = vpop.f32.mrf.mxu3 }
 0x2d6   : > { %v656_v56 = vadd.f32 %v650_v51, %v532_v55  ;;  %v1959_v60 = vadd.f32 %v650_v51, %v588_v59  ;;  %v560_v62 = vpop.f32.mrf.mxu2 }
 0x2d7   : > { %v657_v4 = vadd.f32 %v649_v43, %v560_v62 }
 0x2d8   : > { %v670_v57 = vsel %vm427_vm14, %v656_v56, -inf  ;;  %v676_v1 = vsel %vm427_vm14, %v1959_v60, -inf }
 0x2d9   : > { %671 = vmax.xlane.f32.xlu0 %v670_v57  ;;  %665 = vmax.xlane.f32.xlu1 %v664_v58  ;;  %v673_v7 = vsel %vm427_vm14, %v657_v4, -inf }
 0x2dd   : > { %v616_v61 = vpop.f32.mrf.mxu1 }
 0x2de   : > { %v659_v63 = vadd.f32 %v649_v43, %v616_v61 }
 0x2e0   : > { %v679_v3 = vsel %vm427_vm14, %v659_v63, -inf }
 0x2e1   : > { %677 = vmax.xlane.f32.xlu0 %v676_v1  ;;  %680 = vmax.xlane.f32.xlu2 %v679_v3 }
 0x2e6   : > { %v644_v5 = vpop.f32.mrf.mxu2 }
 0x2e7   : > { %v660_v6 = vadd.f32 %v650_v51, %v644_v5 }
 0x2e9   : > { %674 = vmax.xlane.f32.xlu2 %v673_v7  ;;  %v682_v8 = vsel %vm427_vm14, %v660_v6, -inf }
 0x2ea   : > { %683 = vmax.xlane.f32.xlu1 %v682_v8 }
 0x303   : > { %1488 = vrot.lane.b32.xlu1 %v1487_v9, %s1706_s27  ;;  %s274_s27 = scalar_lea.vmem [#allocation7], %s1365_s4 }
 0x32d   : > { %v663_v11 = vpop.xlane.xlu2 %662 }
 0x32e   : > { %v685_v12 = vsub.f32 %v653_v45, %v663_v11 }
 0x330   : > { %v693_v14 = vmul.f32 1.442695, %v685_v12 }
 0x332   : > { %1522 = vpow2.f32 %v693_v14 }
 0x338   : > { %v1968_v13 = vpop.eup %1522 }
 0x339   : > { %v709_v16 = vsel %vm427_vm14, %v1968_v13, 0.0 }
 0x33a   : > { %710 = vadd.xlane.f32.xlu0 %v709_v16 }
 0x344   : > { %v669_v19 = vpop.xlane.xlu1 %668 }
 0x345   : > { %v687_v20 = vsub.f32 %v655_v50, %v669_v19 }
 0x347   : > { %v697_v27 = vmul.f32 1.442695, %v687_v20 }
 0x349   : > { %1524 = vpow2.f32 %v697_v27 }
 0x34c   : > { %v672_v28 = vpop.xlane.xlu0 %671  ;;  %v666_v29 = vpop.xlane.xlu1 %665 }
 0x34d   : > { %v688_v30 = vsub.f32 %v656_v56, %v672_v28  ;;  %v686_v31 = vsub.f32 %v654_v54, %v666_v29 }
 0x34f   : > { %v1972_v32 = vpop.eup %1524  ;;  %v699_v33 = vmul.f32 1.442695, %v688_v30  ;;  %v695_v34 = vmul.f32 1.442695, %v686_v31 }
 0x350   : > { %v715_v35 = vsel %vm427_vm14, %v1972_v32, 0.0 }
 0x351   : > { %1526 = vpow2.f32 %v699_v33  ;;  %716 = vadd.xlane.f32.xlu2 %v715_v35 }
 0x352   : > { %1528 = vpow2.f32 %v695_v34 }
 0x354   : > { %v681_v36 = vpop.xlane.xlu2 %680  ;;  %v678_v54 = vpop.xlane.xlu0 %677 }
 0x355   : > { %v691_v37 = vsub.f32 %v659_v63, %v681_v36  ;;  %v690_v55 = vsub.f32 %v1959_v60, %v678_v54 }
 0x357   : > { %v1976_v38 = vpop.eup %1526  ;;  %v705_v39 = vmul.f32 1.442695, %v691_v37  ;;  %v703_v57 = vmul.f32 1.442695, %v690_v55 }
 0x358   : > { %v1529_v40 = vpop.eup %1528  ;;  %v718_v41 = vsel %vm427_vm14, %v1976_v38, 0.0 }
 0x359   : > { %719 = vadd.xlane.f32.xlu0 %v718_v41  ;;  %v712_v42 = vsel %vm427_vm14, %v1529_v40, 0.0  ;;  %1530 = vpow2.f32 %v705_v39 }
 0x35a   : > { %713 = vadd.xlane.f32.xlu2 %v712_v42 }
 0x35c   : > { %v675_v50 = vpop.xlane.xlu2 %674 }
 0x35d   : > { %v684_v45 = vpop.xlane.xlu1 %683  ;;  %v689_v51 = vsub.f32 %v657_v4, %v675_v50 }
 0x35e   : > { %v692_v49 = vsub.f32 %v660_v6, %v684_v45 }
 0x35f   : > { %v1981_v43 = vpop.eup %1530  ;;  %v701_v53 = vmul.f32 1.442695, %v689_v51 }
 0x360   : > { %v727_v44 = vsel %vm427_vm14, %v1981_v43, 0.0  ;;  %v707_v52 = vmul.f32 1.442695, %v692_v49 }
 0x361   : > { %728 = vadd.xlane.f32.xlu1 %v727_v44 }
 0x362   : > { %1532 = vpow2.f32 %v707_v52  ;;  %v749_v52 = vperm.slane %v1914_v15, 1 }
 0x363   : > { %1534 = vpow2.f32 %v701_v53 }
 0x364   : > { %1536 = vpow2.f32 %v703_v57  ;;  %v750_v53 = vadd.f32 %v749_v52, %v1858_v0 }
 0x368   : > { %v1990_v56 = vpop.eup %1532 }
 0x369   : > { %v730_v58 = vsel %vm427_vm14, %v1990_v56, 0.0  ;;  %v1535_v59 = vpop.eup %1534 }
 0x36a   : > { %v721_v24 = vsel %vm427_vm14, %v1535_v59, 0.0  ;;  %v1537_v25 = vpop.eup %1536 }
 0x36d   : > { %1493 = vrot.lane.b32.xlu0 %v1487_v9, %s1707_s9  ;;  %s1258_s9 = sshll.u32 %s274_s27, 4  ;;  %s1259_s9 = int_to_ptr.vmem [resolvable:$true] %s1258_s9 }
 0x372   : > { %1498 = vrot.lane.b32.xlu2 %v1487_v9, %s1708_s29  ;;  %s1260_s29 = sshll.u32 %s1257_s8, 4  ;;  %s1261_s29 = int_to_ptr.hbm [resolvable:$true] %s1260_s29 }
 0x375   : > { %v1489_v46 = vpop.permute.xlu1 %1488 }
 0x376   : > { %v1490_v47 = vunpack.i.l.bf16 %v1489_v46  ;;  %v1491_v48 = vunpack.i.h.bf16 %v1489_v46 }
 0x378   : > { %773 = vmatpush.msrb.mxu3 %v1490_v47  ;;  %799 = vmatpush.msrb.mxu0 %v1491_v48 }
 0x37a   : > { %1503 = vrot.lane.b32.xlu1 %v1502_v26, %s1709_s11  ;;  %v724_v26 = vsel %vm427_vm14, %v1537_v25, 0.0 }
 0x397   : > { %731 = vadd.xlane.f32.xlu0 %v730_v58  ;;  %v751_v58 = vadd.f32 %v749_v52, %v1862_v2 }
 0x39b   : > { %722 = vadd.xlane.f32.xlu2 %v721_v24 }
 0x3a3   : > { %725 = vadd.xlane.f32.xlu2 %v724_v26 }
 0x3ad   : > { %v711_v61 = vpop.xlane.xlu0 %710 }
 0x3ae   : > { %1538 = vrcp.f32 %v711_v61 }
 0x3b4   : > { %v1539_v60 = vpop.eup %1538 }
 0x3b5   : > { %v741_v62 = vmul.f32 %v1539_v60, %v1968_v13 }
 0x3b7   : > { %1386 = vmatmul.msk.f32.vlgmr.msrb.gmra.mxu3 %vm427_vm14, %v741_v62 }
 0x3bb   : > { %1013 = vrot.lane.b32.xlu2 %v1917_v17, %s1710_s28 }
 0x3c3   : > { %1039 = vrot.lane.b32.xlu2 %v1922_v18, %s1710_s28 }
 0x3c4   : > { %v717_v63 = vpop.xlane.xlu2 %716 }
 0x3cb   : > { %1508 = vrot.lane.b32.xlu2 %v1507_v23, %s1709_s11  ;;  %s1636_s11 = sshra.s32 %s1261_s29, 4  ;;  %s1637_s11 = int_to_ptr.hbm [resolvable:$true] %s1636_s11 }
 0x3cc   : > { %v720_v4 = vpop.xlane.xlu0 %719  ;;  %s1638_s28 = scalar_lea.hbm %s1637_s11, 16  ;;  %p1643_p7 = scmp.lt.s32.totalorder %s1637_s11, %s2133_s5 }
 0x3cd   : > { %v714_v1 = vpop.xlane.xlu2 %713  ;;  %p1639_p4 = scmp.ne.s32.totalorder %s1637_s11, %s1638_s28  ;;  %p1644_p5 = scmp.lt.s32.totalorder %s1642_s17, %s1638_s28 }
 0x3ce   : > { %1540 = vrcp.f32 %v714_v1 }
 0x3cf   : > { %1542 = vrcp.f32 %v717_v63  ;;  %p1640_p6 = pnand %p1639_p4, %p1795_p11  ;;  %p1645_p8 = por %p1644_p5, %p1643_p7 }
 0x3d0   : > { %1544 = vrcp.f32 %v720_v4 }
 0x3d1   : > { %p1641_p0 = pneg %p1640_p6 }
 0x3d3   : > { %p1646_p9 = pnand %p1645_p8, %p1641_p0 }
 0x3d4   : > { %v1541_v3 = vpop.eup %1540  ;;  %v729_v12 = vpop.xlane.xlu1 %728 }
 0x3d5   : > { %v742_v5 = vmul.f32 %v1541_v3, %v1529_v40  ;;  %v1543_v6 = vpop.eup %1542  ;;  %v1499_v17 = vpop.permute.xlu2 %1498 }
 0x3d6   : > { %v1545_v7 = vpop.eup %1544  ;;  %v743_v11 = vmul.f32 %v1543_v6, %v1972_v32  ;;  %v1501_v22 = vunpack.i.h.bf16 %v1499_v17  ;;  %v1500_v23 = vunpack.i.l.bf16 %v1499_v17 }
 0x3d7   : > { %1387 = vmatmul.msk.f32.vlgmr.msrb.gmra.mxu0 %vm427_vm14, %v742_v5  ;;  %v744_v21 = vmul.f32 %v1545_v7, %v1976_v38 }
 0x3df   : > { %v1494_v8 = vpop.permute.xlu0 %1493 }
 0x3e0   : > { %v1496_v18 = vunpack.i.h.bf16 %v1494_v8  ;;  %v1495_v9 = vunpack.i.l.bf16 %v1494_v8 }
 0x3e2   : > { %860 = vmatpush.msrb.mxu2 %v1495_v9  ;;  %886 = vmatpush.msra.mxu3 %v1496_v18 }
 0x3e3   : > { %1390 = vmatmul.msk.f32.vlgmr.msrb.gmra.mxu2 %vm427_vm14, %v743_v11  ;;  %1391 = vmatmul.msk.f32.vlgmr.msra.gmra.mxu3 %vm427_vm14, %v744_v21  ;;  %v291_v21 = vld [vmem:[%s2130_s2 + $0x38] sm:$0xff] }
 0x3e4   : > { %947 = vmatpush.msra.mxu2 %v1500_v23  ;;  %973 = vmatpush.msrb.mxu3 %v1501_v22  ;;  %v289_v22 = vld [vmem:[%s2130_s2 + $0x28] sm:$0xff] }
 0x3ec   : > { %v1504_v14 = vpop.permute.xlu1 %1503 }
 0x3ed   : > { %v1506_v13 = vunpack.i.h.bf16 %v1504_v14  ;;  %v1505_v16 = vunpack.i.l.bf16 %v1504_v14 }
 0x3ef   : > { %829 = vmatpush.msra.mxu1 %v1505_v16  ;;  %916 = vmatpush.msra.mxu0 %v1506_v13 }
 0x40a   : > { %v732_v29 = vpop.xlane.xlu0 %731 }
 0x40e   : > { %v723_v19 = vpop.xlane.xlu2 %722 }
 0x40f   : > { %1546 = vrcp.f32 %v723_v19 }
 0x410   : > { %1548 = vrcp.f32 %v729_v12  ;;  %v285_v12 = vld [vmem:[%s2130_s2 + $0x8] sm:$0xff] }
 0x415   : > { %v1547_v20 = vpop.eup %1546 }
 0x416   : > { %v745_v27 = vmul.f32 %v1547_v20, %v1535_v59  ;;  %v726_v28 = vpop.xlane.xlu2 %725  ;;  %v1549_v30 = vpop.eup %1548 }
 0x417   : > { %1550 = vrcp.f32 %v726_v28  ;;  %v747_v32 = vmul.f32 %v1549_v30, %v1981_v43 }
 0x418   : > { %1394 = vmatmul.msk.f32.vlgmr.msra.gmra.mxu2 %vm427_vm14, %v745_v27  ;;  %1552 = vrcp.f32 %v732_v29 }
 0x41d   : > { %v1551_v31 = vpop.eup %1550 }
 0x41e   : > { %v746_v33 = vmul.f32 %v1551_v31, %v1537_v25  ;;  %v1014_v34 = vpop.permute.xlu2 %1013  ;;  %v1553_v35 = vpop.eup %1552 }
 0x41f   : > { %1034 = vmatpush.msrb.mxu2 %v1014_v34  ;;  %v748_v36 = vmul.f32 %v1553_v35, %v1990_v56 }
 0x420   : > { %1395 = vmatmul.msk.f32.vlgmr.msrb.gmra.mxu3 %vm427_vm14, %v746_v33  ;;  %1398 = vmatmul.msk.f32.vlgmr.msrb.gmra.mxu2 %vm427_vm14, %v747_v32 }
 0x421   : > { %1197 = vmatpush.msra.mxu2 %v291_v21 }
 0x423   : > { %1198 = vmatpush.msra.mxu2 %v289_v22 }
 0x426   : > { %v1040_v37 = vpop.permute.xlu2 %1039 }
 0x427   : > { %1060 = vmatpush.msra.mxu3 %v1040_v37  ;;  %v298_v37 = vld [vmem:[%s2131_s3 + $0x30] sm:$0xff] }
 0x428   : > { %1399 = vmatmul.msk.f32.vlgmr.msra.gmra.mxu3 %vm427_vm14, %v748_v36  ;;  %v299_v36 = vld [vmem:[%s2131_s3 + $0x38] sm:$0xff] }
 0x42e   : > { %v1509_v39 = vpop.permute.xlu2 %1508 }
 0x42f   : > { %v1511_v40 = vunpack.i.h.bf16 %v1509_v39  ;;  %v1510_v41 = vunpack.i.l.bf16 %v1509_v39 }
 0x431   : > { %1003 = vmatpush.msrb.mxu1 %v1510_v41  ;;  %1090 = vmatpush.msrb.mxu0 %v1511_v40  ;;  %v297_v41 = vld [vmem:[%s2131_s3 + $0x28] sm:$0xff] }
 0x43a   : > { %v775_v38 = vpop.f32.mrf.mxu3 }
 0x43b   : > { %1388 = vmatmul.msk.f32.vlgmr.msra.gmra.mxu1 %vm427_vm14, %v775_v38 }
 0x43c   : > { %1226 = vmatpush.msra.mxu1 %v299_v36 }
 0x43e   : > { %1227 = vmatpush.msra.mxu1 %v298_v37 }
 0x440   : > { %1228 = vmatpush.msra.mxu1 %v297_v41 }
 0x454   : > { %v801_v42 = vpop.f32.mrf.mxu0 }
 0x455   : > { %1389 = vmatmul.msk.f32.gmra.mxu1 %vm427_vm14, %v801_v42 }
 0x466   : > { %v862_v43 = vpop.f32.mrf.mxu2  ;;  %v888_v44 = vpop.f32.mrf.mxu3 }
 0x467   : > { %1392 = vmatmul.msk.f32.vlgmr.msra.gmra.mxu0 %vm427_vm14, %v862_v43 }
 0x46f   : > { %1393 = vmatmul.msk.f32.gmra.mxu0 %vm427_vm14, %v888_v44  ;;  %v296_v44 = vld [vmem:[%s2131_s3 + $0x20] sm:$0xff] }
 0x470   : > { %1229 = vmatpush.msra.mxu1 %v296_v44 }
 0x49b   : > { %v949_v45 = vpop.f32.mrf.mxu2 }
 0x49c   : > { %1396 = vmatmul.msk.f32.vlgmr.msrb.gmra.mxu1 %vm427_vm14, %v949_v45 }
 0x4a3   : > { %v975_v46 = vpop.f32.mrf.mxu3  ;;  %v1036_v47 = vpop.f32.mrf.mxu2 }
 0x4a4   : > { %1397 = vmatmul.msk.f32.gmra.mxu1 %vm427_vm14, %v975_v46  ;;  %1400 = vmatmul.msk.f32.vlgmr.msrb.gmra.mxu0 %vm427_vm14, %v1036_v47  ;;  %v295_v46 = vld [vmem:[%s2131_s3 + $0x18] sm:$0xff] }
 0x4a5   : > { %1230 = vmatpush.msra.mxu1 %v295_v46 }
 0x4ab   : > { %v1062_v48 = vpop.f32.mrf.mxu3 }
 0x4ac   : > { %1401 = vmatmul.msk.f32.gmra.mxu0 %vm427_vm14, %v1062_v48  ;;  %vm1211_vm14 = vcmask 523264  }
 0x4b8   : > { %v831_v49 = vpop.f32.mrf.mxu1 }
 0x4b9   : > { %v837_v56 = vadd.f32 %v831_v49, %v750_v53 }
 0x4d2   : > { %v834_v51 = vpop.f32.mrf.mxu1 }
 0x4d3   : > { %v838_v26 = vadd.f32 %v834_v51, %v751_v58 }
 0x4e4   : > { %v918_v50 = vpop.f32.mrf.mxu0 }
 0x4e5   : > { %v924_v57 = vadd.f32 %v918_v50, %v837_v56 }
 0x4ec   : > { %v921_v54 = vpop.f32.mrf.mxu0 }
 0x4ed   : > { %v925_v62 = vadd.f32 %v921_v54, %v838_v26 }
 0x519   : > { %v1005_v55 = vpop.f32.mrf.mxu1 }
 0x51a   : > { %v1011_v59 = vadd.f32 %v1005_v55, %v924_v57 }
 0x521   : > { %v1092_v24 = vpop.f32.mrf.mxu0  ;;  %v1008_v60 = vpop.f32.mrf.mxu1 }
 0x522   : > { %v2026_v25 = vadd.f32 %v1092_v24, %v1011_v59  ;;  %v1012_v63 = vadd.f32 %v1008_v60, %v925_v62 }
 0x524   : > { %v1100_v61 = vsel %vm308_vm0, %v2026_v25, 0.0 }
 0x525   : > { %1101 = vadd.xlane.f32.xlu0 %v1100_v61 }
 0x529   : > { %v1095_v1 = vpop.f32.mrf.mxu0 }
 0x52a   : > { %v2030_v0 = vadd.f32 %v1095_v1, %v1012_v63 }
 0x52c   : > { %v1103_v3 = vsel %vm308_vm0, %v2030_v0, 0.0 }
 0x52d   : > { %1104 = vadd.xlane.f32.xlu2 %v1103_v3 }
 0x598   : > { %v1102_v2 = vpop.xlane.xlu0 %1101 }
 0x599   : > { %v1106_v4 = vmul.f32 %v1102_v2, %v1866_v10 }
 0x59b   : > { %v2036_v5 = vsub.f32 %v2026_v25, %v1106_v4 }
 0x59d   : > { %v1110_v6 = vmul.f32 %v2036_v5, %v2036_v5 }
 0x59f   : > { %v1112_v7 = vsel %vm308_vm0, %v1110_v6, 0.0 }
 0x5a0   : > { %1113 = vadd.xlane.f32.xlu0 %v1112_v7  ;;  %v1105_v17 = vpop.xlane.xlu2 %1104 }
 0x5a1   : > { %v1107_v8 = vmul.f32 %v1105_v17, %v1866_v10  ;;  %v287_v10 = vld [vmem:[%s2130_s2 + $0x18] sm:$0xff] }
 0x5a2   : > { %1199 = vmatpush.msra.mxu2 %v287_v10 }
 0x5a3   : > { %v2043_v18 = vsub.f32 %v2030_v0, %v1107_v8 }
 0x5a4   : > { %1200 = vmatpush.msra.mxu2 %v285_v12 }
 0x5a5   : > { %v1111_v9 = vmul.f32 %v2043_v18, %v2043_v18 }
 0x5a7   : > { %v1115_v11 = vsel %vm308_vm0, %v1111_v9, 0.0  ;;  %v293_v9 = vld [vmem:[%s2131_s3 + $0x8] sm:$0xff] }
 0x5a8   : > { %1116 = vadd.xlane.f32.xlu0 %v1115_v11  ;;  %v292_v11 = vld [vmem:[%s2131_s3] sm:$0xff] }
 0x613   : > { %v1114_v23 = vpop.xlane.xlu0 %1113 }
 0x614   : > { %v1118_v14 = vmul.f32 0.032258064, %v1114_v23 }
 0x616   : > { %1554 = vrsqrt.f32 %v1118_v14  ;;  %vm1127_vm2 = vcmp.eq.f32.partialorder %v1118_v14, inf  ;;  %v1130_v35 = vand.u32 2147483648, %v1118_v14  ;;  %vm1129_vm3 = vcmp.eq.f32.partialorder %v1118_v14, 0.0 }
 0x61b   : > { %v1117_v13 = vpop.xlane.xlu0 %1116 }
 0x61c   : > { %v1555_v16 = vpop.eup %1554  ;;  %v1119_v19 = vmul.f32 0.032258064, %v1117_v13  ;;  %v1210_v13 = vperm.slane %v1914_v15, 3 }
 0x61d   : > { %v1121_v20 = vmul.f32 %v1555_v16, %v1118_v14 }
 0x61e   : > { %1556 = vrsqrt.f32 %v1119_v19  ;;  %vm1139_vm4 = vcmp.eq.f32.partialorder %v1119_v19, inf  ;;  %v1142_v48 = vand.u32 2147483648, %v1119_v19  ;;  %vm1141_vm5 = vcmp.eq.f32.partialorder %v1119_v19, 0.0 }
 0x61f   : > { %v1122_v27 = vmul.f32 %v1555_v16, %v1121_v20 }
 0x621   : > { %v1123_v28 = vmul.f32 0.5, %v1122_v27 }
 0x623   : > { %v1124_v29 = vsub.f32 1.5, %v1123_v28 }
 0x624   : > { %v1557_v30 = vpop.eup %1556 }
 0x625   : > { %v1125_v31 = vmul.f32 %v1555_v16, %v1124_v29  ;;  %v1133_v32 = vmul.f32 %v1557_v30, %v1119_v19 }
 0x627   : > { %v1126_v33 = vmul.f32 %v1125_v31, %v1118_v14  ;;  %v1134_v34 = vmul.f32 %v1557_v30, %v1133_v32 }
 0x629   : > { %v1128_v38 = vsel %vm1127_vm2, %v1118_v14, %v1126_v33  ;;  %v1135_v39 = vmul.f32 0.5, %v1134_v34 }
 0x62a   : > { %v1131_v40 = vsel %vm1129_vm3, %v1130_v35, %v1128_v38 }
 0x62b   : > { %v1144_v42 = vadd.f32 1e-06, %v1131_v40  ;;  %v1136_v43 = vsub.f32 1.5, %v1135_v39 }
 0x62d   : > { %1558 = vrcp.f32 %v1144_v42  ;;  %v1137_v45 = vmul.f32 %v1557_v30, %v1136_v43  ;;  %v1157_v55 = vand.u32 2147483648, %v1144_v42  ;;  %v1155_v57 = vand.u32 2147483647, %v1144_v42 }
 0x62e   : > { %vm1151_vm7 = vweird.f32 %v1144_v42 }
 0x62f   : > { %v1138_v47 = vmul.f32 %v1137_v45, %v1119_v19  ;;  %v1158_v24 = vor.u32 1.1754944e-38, %v1157_v55  ;;  %vm1156_vm9 = vcmp.eq.f32.partialorder %v1155_v57, 8.507059e+37 }
 0x631   : > { %v1140_v49 = vsel %vm1139_vm4, %v1119_v19, %v1138_v47 }
 0x632   : > { %v1143_v50 = vsel %vm1141_vm5, %v1142_v48, %v1140_v49 }
 0x633   : > { %v1559_v51 = vpop.eup %1558  ;;  %v1145_v52 = vadd.f32 1e-06, %v1143_v50 }
 0x634   : > { %v1147_v53 = vmul.f32 %v1559_v51, %v1144_v42  ;;  %vm1152_vm6 = vweird.f32 %v1559_v51 }
 0x635   : > { %1560 = vrcp.f32 %v1145_v52  ;;  %vm1153_vm8 = vmor %vm1151_vm7, %vm1152_vm6  ;;  %v1172_v1 = vand.u32 2147483648, %v1145_v52  ;;  %v1170_v2 = vand.u32 2147483647, %v1145_v52  ;;  %vm1166_vm11 = vweird.f32 %v1145_v52 }
 0x636   : > { %v1148_v54 = vsub.f32 1.0, %v1147_v53 }
 0x637   : > { %v1173_v6 = vor.u32 1.1754944e-38, %v1172_v1  ;;  %vm1171_vm13 = vcmp.eq.f32.partialorder %v1170_v2, 8.507059e+37 }
 0x638   : > { %v1149_v56 = vmul.f32 %v1559_v51, %v1148_v54 }
 0x63a   : > { %v1150_v58 = vadd.f32 %v1559_v51, %v1149_v56 }
 0x63b   : > { %v1561_v59 = vpop.eup %1560 }
 0x63c   : > { %v1154_v26 = vsel %vm1153_vm8, %v1559_v51, %v1150_v58  ;;  %v1162_v61 = vmul.f32 %v1561_v59, %v1145_v52  ;;  %vm1167_vm10 = vweird.f32 %v1561_v59 }
 0x63d   : > { %v1159_v60 = vsel %vm1156_vm9, %v1158_v24, %v1154_v26  ;;  %vm1168_vm12 = vmor %vm1166_vm11, %vm1167_vm10 }
 0x63e   : > { %v1176_v62 = vmul.f32 %v1159_v60, %v2036_v5  ;;  %v1163_v63 = vsub.f32 1.0, %v1162_v61  ;;  %v294_v5 = vld [vmem:[%s2131_s3 + $0x10] sm:$0xff] }
 0x63f   : > { %1231 = vmatpush.msra.mxu1 %v294_v5 }
 0x640   : > { %1402 = vmatmul.msk.f32.vlgmr.msra.gmra.mxu2 %vm308_vm0, %v1176_v62  ;;  %v1164_v3 = vmul.f32 %v1561_v59, %v1163_v63 }
 0x641   : > { %1232 = vmatpush.msra.mxu1 %v293_v9 }
 0x642   : > { %v1165_v4 = vadd.f32 %v1561_v59, %v1164_v3 }
 0x643   : > { %1233 = vmatpush.msra.mxu1 %v292_v11 }
 0x644   : > { %v1169_v7 = vsel %vm1168_vm12, %v1561_v59, %v1165_v4 }
 0x645   : > { %v1174_v17 = vsel %vm1171_vm13, %v1173_v6, %v1169_v7 }
 0x646   : > { %v1177_v8 = vmul.f32 %v1174_v17, %v2043_v18  ;;  %v1178_v18 = vperm.slane %v1914_v15, 2 }
 0x648   : > { %1403 = vmatmul.msk.f32.gmra.mxu2 %vm308_vm0, %v1177_v8 }
 0x6c3   : > { %v1202_v21 = vpop.f32.mrf.mxu2 }
 0x6c4   : > { %v1203_v22 = vadd.f32 %v1202_v21, %v1178_v18 }
 0x6c6   : > { %v1208_v10 = vmax.f32 %v1203_v22, 0.0 }
 0x6c8   : > { %1404 = vmatmul.msk.f32.vlgmr.msra.gmra.mxu1 %vm1211_vm14, %v1208_v10 }
 0x6cb   : > { %v1205_v23 = vpop.f32.mrf.mxu2 }
 0x6cc   : > { %v1206_v12 = vadd.f32 %v1205_v23, %v1178_v18 }
 0x6ce   : > { %v1209_v14 = vmax.f32 %v1206_v12, 0.0 }
 0x6d0   : > { %1405 = vmatmul.msk.f32.gmra.mxu1 %vm1211_vm14, %v1209_v14 }
 0x745   : > { %v1235_v16 = vpop.f32.mrf.mxu1 }
 0x746   : > { %v1236_v19 = vadd.f32 %v1235_v16, %v1210_v13 }
 0x748   : > { %v1241_v20 = vadd.f32 %v1236_v19, %v2026_v25 }
 0x74a   : > { %1243 = vst.msk [vmem:[%s274_s27] sm:$0xff] %vm308_vm0, %v1241_v20 }
 0x74d   : > { %v1238_v27 = vpop.f32.mrf.mxu1 }
 0x74e   : > { %v1239_v28 = vadd.f32 %v1238_v27, %v1210_v13 }
 0x750   : > { %v1242_v15 = vadd.f32 %v1239_v28, %v2030_v0 }
 0x752   : > { %1244 = vst.msk [vmem:[%s274_s27 + $0x8] sm:$0xff] %vm308_vm0, %v1242_v15 }
 0x753   : > { %1649 = shalt.err (!%p1646_p9)
}
 0x754   : > { %s1711_s23 = smov 128   ;;  %s1712_s15 = smov 8  }
 0x755   : > { %1418 = dma.vmem_to_hbm [thread:$0]  (%p1795_p11), %s1259_s9, 256, %s1261_s29, %s1246_s22, %s1711_s23, %s1711_s23, %s1712_s15  }
 0x756 PF: > { %s1275_s25 = sand.u32 1, %s1680_s18   ;;  %p2143_p10 = scmp.ge.s32.totalorder %s1692_s21, 2 }
 0x757   : > { %s1276_s4 = scalar_lea.sflag [#allocation4], %s1275_s25 }
 0x758   : > { %p1429_p1 = pnand %p2143_p10, %p1799_p12 }
 0x75a   : > { %p1430_p2 = pneg %p1429_p1 }
 0x75c   : > { %1675 = dma.done.wait (%p1430_p2), %s1276_s4, 256  }
 0x75d   : > { %1677 = vsyncadd (%p1430_p2), %s1276_s4, 4294967040  ;;  %s2144_s7 = sld [smem:[#allocation11_spill]]  ;;  %p19_p3 = scmp.ge.s32.totalorder %s1768_s24, 4  }
 0x75e   : > { %s2145_s18 = smov %s1684_s19  ;;  %s2146_s19 = smov %s1688_s20 }
 0x75f   : > { %s2148_s21 = smov %s1768_s24  ;;  %21 = sbr.rel (!%p19_p3) target bundleno = 8 (0x8), region = 92 }
 0x763   : > { %s2147_s20 = smov %s2144_s7 }
 0x764   :  { %1282 = vsyncpa [#allocation3], 1 }
 0x765   :  { %1284 = vsyncpa [#allocation3 + $0x1], 1 }
 0x766   :  { %1285 = vsyncpa [#allocation6], 1 }
 0x767   :  { %1286 = vsyncpa [#allocation4], 1 }
 0x768   :  { %1288 = vsyncpa [#allocation4 + $0x1], 1 }

</bundles_post_ra>
